<compile_context>
chip_gen: v6e
topology: v6e:2x2x1
jax: 0.10.0
libtpu: 0.0.40
codegen_flags: <defaults>
</compile_context>

<pallas_src>
import functools

import jax
import jax.numpy as jnp
from jax import lax
from jax.experimental import pallas as pl
from jax.experimental.pallas import tpu as pltpu

ROW_ALIGN = 8                    # f32 sublane tile
LANE = 128                       # lane width
NEG = -1e30                      # "minus infinity" for padded vocab lanes (finite: no NaNs)
VMEM_LIMIT = 32 * 1024 * 1024    # scoped-VMEM budget that is safe on v5e/v6e/v7x


def _round_up(x, m):
    return ((x + m - 1) // m) * m


def _pad_axis(x, axis, target, value=0.0):
    pad = target - x.shape[axis]
    if pad <= 0:
        return x
    widths = [(0, 0)] * x.ndim
    widths[axis] = (0, pad)
    return jnp.pad(x, widths, constant_values=value)


# ------------------------- Pallas kernels -------------------------

def _proj2_kernel(x_ref, w1_ref, b1_ref, w2_ref, b2_ref, o_ref):
    # y = tanh(x @ W1 + b1) @ W2 + b2 ; MXU operands in bf16, accumulation + tanh in f32.
    h = jnp.dot(x_ref[...].astype(jnp.bfloat16), w1_ref[...],
                preferred_element_type=jnp.float32) + b1_ref[...]
    h = jnp.tanh(h)
    y = jnp.dot(h.astype(jnp.bfloat16), w2_ref[...],
                preferred_element_type=jnp.float32) + b2_ref[...]
    o_ref[...] = y.astype(o_ref.dtype)


def fused_projection(x, w1, b1, w2, b2, *, tile_m=256):
    """(M, K1) -> tanh(x@W1+b1) @ W2 + b2 -> (M, Np) with Np = round_up(N, 128).

    Hidden / output feature dims are zero-padded to 128 lanes (padded columns are
    exactly zero), rows are tiled with a parallel grid (pipelined, megacore-shardable).
    """
    M, K1 = x.shape
    K2 = w1.shape[1]
    N = w2.shape[1]
    K2p = _round_up(K2, LANE)
    Np = _round_up(N, LANE)

    w1p = _pad_axis(w1, 1, K2p).astype(jnp.bfloat16)
    b1p = _pad_axis(b1.reshape(1, K2).astype(jnp.float32), 1, K2p)
    w2p = _pad_axis(_pad_axis(w2, 0, K2p), 1, Np).astype(jnp.bfloat16)
    b2p = _pad_axis(b2.reshape(1, N).astype(jnp.float32), 1, Np)

    tm = min(tile_m, _round_up(M, ROW_ALIGN))
    Mp = _round_up(M, tm)
    xp = _pad_axis(x, 0, Mp)

    out = pl.pallas_call(
        _proj2_kernel,
        out_shape=jax.ShapeDtypeStruct((Mp, Np), jnp.float32),
        grid=(Mp // tm,),
        in_specs=[
            pl.BlockSpec((tm, K1), lambda i: (i, 0)),
            pl.BlockSpec((K1, K2p), lambda i: (0, 0)),
            pl.BlockSpec((1, K2p), lambda i: (0, 0)),
            pl.BlockSpec((K2p, Np), lambda i: (0, 0)),
            pl.BlockSpec((1, Np), lambda i: (0, 0)),
        ],
        out_specs=pl.BlockSpec((tm, Np), lambda i: (i, 0)),
        compiler_params=pltpu.CompilerParams(
            dimension_semantics=("parallel",),
            vmem_limit_bytes=VMEM_LIMIT),
    )(xp, w1p, b1p, w2p, b2p)
    return out[:M]


def _joint_kernel(enc_ref, pred_ref, w_ref, b_ref, o_ref):
    # enc_ref: (1, TILE_T, Hp) f32, pred_ref: (1, U1p, Hp) f32,
    # w_ref: (Hp, Vp) bf16, b_ref: (1, Vp) f32, o_ref: (1, TILE_T, U1p, Vp) f32.
    tt, hp = enc_ref.shape[1], enc_ref.shape[2]
    u1p = pred_ref.shape[1]
    vp = w_ref.shape[1]
    enc = enc_ref[0]                                     # (TILE_T, Hp)
    pred = pred_ref[0]                                   # (U1p, Hp)
    # One broadcasted VPU add + tanh over the whole slab (no per-row slices).
    h = jnp.tanh(enc[:, None, :] + pred[None, :, :])     # (TILE_T, U1p, Hp) f32
    # ONE MXU matmul over the flattened slab: bf16 operands, f32 accumulation.
    logits = jnp.dot(h.reshape(tt * u1p, hp).astype(jnp.bfloat16), w_ref[...],
                     preferred_element_type=jnp.float32) + b_ref[...]
    m = jnp.max(logits, axis=-1, keepdims=True)          # padded lanes carry -1e30 bias
    z = logits - m
    lse = jnp.log(jnp.sum(jnp.exp(z), axis=-1, keepdims=True))
    o_ref[...] = (z - lse).reshape(1, tt, u1p, vp)       # lane-dense (Vp = k*128) stores


def joint_log_probs(enc_h, pred_h, w_out, b_out):
    """enc_h: (B,T,Hp), pred_h: (B,U1,Hp) -> (B, Tp, U1p, Vp) joint log-probs.

    Vocab lanes padded to 128 (bias -1e30 there, never read), U1 rows padded to 8,
    T padded to TILE_T. Caller slices back to (B, T, U1, :).
    """
    B, T, Hp = enc_h.shape
    U1 = pred_h.shape[1]
    H, V = w_out.shape
    Vp = _round_up(V, LANE)
    U1p = _round_up(U1, ROW_ALIGN)

    # TILE_T: multiple of 8, output block capped at ~2 MiB so it is v7x (64 MiB VMEM) safe.
    per_row = U1p * Vp * 4
    tile_t = max(ROW_ALIGN,
                 min(_round_up(T, ROW_ALIGN),
                     (2 * 1024 * 1024 // per_row) // ROW_ALIGN * ROW_ALIGN))
    Tp = _round_up(T, tile_t)

    enc_p = _pad_axis(enc_h, 1, Tp)
    pred_p = _pad_axis(pred_h, 1, U1p)
    w = _pad_axis(_pad_axis(w_out, 0, Hp), 1, Vp).astype(jnp.bfloat16)
    b = _pad_axis(b_out.reshape(1, V).astype(jnp.float32), 1, Vp, value=NEG)

    # TODO(synk): for large vocabularies, gather only the blank/label log-probs in-kernel
    # (scalar-prefetch the labels) instead of materializing the full (B,T,U1,V) lattice.
    return pl.pallas_call(
        _joint_kernel,
        out_shape=jax.ShapeDtypeStruct((B, Tp, U1p, Vp), jnp.float32),
        grid=(B, Tp // tile_t),
        in_specs=[
            pl.BlockSpec((1, tile_t, Hp), lambda bi, ti: (bi, ti, 0)),
            pl.BlockSpec((1, U1p, Hp), lambda bi, ti: (bi, 0, 0)),
            pl.BlockSpec((Hp, Vp), lambda bi, ti: (0, 0)),
            pl.BlockSpec((1, Vp), lambda bi, ti: (0, 0)),
        ],
        out_specs=pl.BlockSpec((1, tile_t, U1p, Vp), lambda bi, ti: (bi, ti, 0, 0)),
        compiler_params=pltpu.CompilerParams(
            dimension_semantics=("parallel", "parallel"),
            vmem_limit_bytes=VMEM_LIMIT),
    )(enc_p, pred_p, w, b)


# ------------------------- JAX glue (model plumbing) -------------------------

def add_blank(ys, blank, ignore_id):
    bs = ys.shape[0]
    blank_col = jnp.full((bs, 1), blank, dtype=ys.dtype)
    out = jnp.concatenate([blank_col, ys], axis=1)
    return jnp.where(out == ignore_id, blank, out)


def rnnt_loss_from_log_probs(log_probs, labels, logit_lengths, label_lengths, blank=0):
    """Mean (over batch) RNN-T negative log-likelihood (torchaudio reduction='mean')."""
    # TODO(synk): the RNN-T lattice DP is an inherently sequential scan; it stays in plain
    # JAX — the heavy joint/log-softmax compute feeding it runs in the Pallas kernel.
    B, T, U1, _ = log_probs.shape
    U = U1 - 1
    blank_lp = log_probs[..., blank]                                        # (B, T, U+1)
    label_lp = jnp.take_along_axis(
        log_probs[:, :, :U, :], labels[:, None, :, None], axis=-1)[..., 0]  # (B, T, U)

    def per_seq(blank_b, label_b, t_len, u_len):
        # alpha[0, u] = cumsum of label emissions at t = 0
        alpha0 = jnp.concatenate(
            [jnp.zeros((1,), jnp.float32), jnp.cumsum(label_b[0])])         # (U+1,)

        def t_step(alpha_prev, t):
            base = alpha_prev + blank_b[t - 1]                              # (U+1,)

            def u_step(carry, xs):
                base_u, lab = xs
                a = jnp.logaddexp(base_u, carry + lab)
                return a, a

            a0 = base[0]
            _, rest = lax.scan(u_step, a0, (base[1:], label_b[t]))
            alpha_t = jnp.concatenate([a0[None], rest])
            return alpha_t, alpha_t

        _, alpha_rest = lax.scan(t_step, alpha0, jnp.arange(1, T))
        alphas = jnp.concatenate([alpha0[None, :], alpha_rest], axis=0)     # (T, U+1)
        final = alphas[t_len - 1, u_len] + blank_b[t_len - 1, u_len]
        return -final

    losses = jax.vmap(per_seq)(blank_lp, label_lp, logit_lengths, label_lengths)
    return jnp.mean(losses)


def init_params(key, feat_dim, enc_dim, pred_dim, joint_dim, vocab_size):
    ks = jax.random.split(key, 6)
    s = 0.1
    return dict(
        enc_w=jax.random.normal(ks[0], (feat_dim, enc_dim), jnp.float32) * s,
        enc_b=jnp.zeros((enc_dim,), jnp.float32),
        embed=jax.random.normal(ks[1], (vocab_size, pred_dim), jnp.float32) * s,
        pred_w=jax.random.normal(ks[2], (pred_dim, pred_dim), jnp.float32) * s,
        pred_b=jnp.zeros((pred_dim,), jnp.float32),
        joint_enc_w=jax.random.normal(ks[3], (enc_dim, joint_dim), jnp.float32) * s,
        joint_enc_b=jnp.zeros((joint_dim,), jnp.float32),
        joint_pred_w=jax.random.normal(ks[4], (pred_dim, joint_dim), jnp.float32) * s,
        joint_pred_b=jnp.zeros((joint_dim,), jnp.float32),
        joint_out_w=jax.random.normal(ks[5], (joint_dim, vocab_size), jnp.float32) * s,
        joint_out_b=jnp.zeros((vocab_size,), jnp.float32),
    )


def transducer_forward(params, speech, speech_lengths, text, text_lengths,
                       blank=0, ignore_id=-1):
    """Frontend + Encoder + Predictor + Joint + RNN-T loss (returns scalar loss)."""
    B, T, F = speech.shape

    # --- Encoder + joint encoder projection, fused Pallas kernel:
    #     enc_h = tanh(speech @ W_enc + b_enc) @ W_joint_enc + b_joint_enc ---
    enc_h = fused_projection(speech.reshape(B * T, F),
                             params["enc_w"], params["enc_b"],
                             params["joint_enc_w"], params["joint_enc_b"])
    Hp = enc_h.shape[1]
    enc_h = enc_h.reshape(B, T, Hp)

    t_idx = jnp.arange(T, dtype=jnp.int32)
    encoder_out_lens = (t_idx[None, :] < speech_lengths[:, None]).sum(axis=1).astype(jnp.int32)

    # --- Predictor + joint predictor projection, fused Pallas kernel ---
    ys_in = add_blank(text, blank, ignore_id)                               # (B, U+1)
    U1 = ys_in.shape[1]
    emb = jnp.take(params["embed"], ys_in, axis=0)                          # (B, U+1, E)
    pred_h = fused_projection(emb.reshape(B * U1, -1),
                              params["pred_w"], params["pred_b"],
                              params["joint_pred_w"], params["joint_pred_b"])
    pred_h = pred_h.reshape(B, U1, Hp)

    # --- Joint network: fused add/tanh/matmul/log_softmax over (TILE_T x U1) slabs ---
    lattice = joint_log_probs(enc_h, pred_h, params["joint_out_w"], params["joint_out_b"])
    log_probs = lattice[:, :T, :U1, :]   # strip T/U row padding; padded vocab lanes never read

    # --- RNN-T loss (mean over batch, blank=0) ---
    rnnt_text = jnp.where(text == ignore_id, 0, text).astype(jnp.int32)
    loss = rnnt_loss_from_log_probs(log_probs, rnnt_text, encoder_out_lens,
                                    text_lengths.astype(jnp.int32), blank=blank)
    return loss


if __name__ == "__main__":
    key = jax.random.PRNGKey(0)
    B, T, F = 2, 8, 16
    enc_dim = pred_dim = joint_dim = 32
    vocab = 16
    U = 4

    k_sp, k_p = jax.random.split(key)
    speech = jax.random.normal(k_sp, (B, T, F), jnp.float32)
    speech_lengths = jnp.array([8, 6], jnp.int32)
    text = jnp.array([[1, 2, 3, 4], [5, 6, -1, -1]], jnp.int32)   # -1 = ignore_id padding
    text_lengths = jnp.array([4, 2], jnp.int32)

    params = init_params(k_p, F, enc_dim, pred_dim, joint_dim, vocab)

    loss = jax.jit(transducer_forward)(params, speech, speech_lengths, text, text_lengths)
    loss = jax.block_until_ready(loss)
    assert loss.shape == () and bool(jnp.isfinite(loss))
    print("KERNEL_OK")
</pallas_src>

<mosaic_0001>
module attributes {stable_mosaic.version = 11 : i64} {
  func.func @_proj2_kernel(%arg0: i32, %arg1: memref<16x32xf32, #tpu.memory_space<vmem>>, %arg2: memref<32x128xbf16, #tpu.memory_space<vmem>>, %arg3: memref<1x128xf32, #tpu.memory_space<vmem>>, %arg4: memref<128x128xbf16, #tpu.memory_space<vmem>>, %arg5: memref<1x128xf32, #tpu.memory_space<vmem>>, %arg6: memref<16x128xf32, #tpu.memory_space<vmem>>) attributes {dimension_semantics = [#tpu.dimension_semantics<parallel>], iteration_bounds = array<i64: 1>, scalar_prefetch = 0 : i64, scratch_operands = 0 : i64, tpu.core_type = #tpu.core_type<tc>, window_params = [{transform_indices = @transform_0, window_bounds = array<i64: 16, 32>}, {pipeline_mode = #tpu.pipeline_mode<synchronous>, transform_indices = @transform_1, window_bounds = array<i64: 32, 128>}, {pipeline_mode = #tpu.pipeline_mode<synchronous>, transform_indices = @transform_2, window_bounds = array<i64: 1, 128>}, {pipeline_mode = #tpu.pipeline_mode<synchronous>, transform_indices = @transform_3, window_bounds = array<i64: 128, 128>}, {pipeline_mode = #tpu.pipeline_mode<synchronous>, transform_indices = @transform_4, window_bounds = array<i64: 1, 128>}, {transform_indices = @transform_5, window_bounds = array<i64: 16, 128>}]} {
    %c0 = arith.constant 0 : index
    %c0_0 = arith.constant 0 : index
    %0 = vector.load %arg1[%c0, %c0_0] : memref<16x32xf32, #tpu.memory_space<vmem>>, vector<16x32xf32>
    %1 = arith.truncf %0 : vector<16x32xf32> to vector<16x32xbf16>
    %c0_1 = arith.constant 0 : index
    %c0_2 = arith.constant 0 : index
    %2 = vector.load %arg2[%c0_1, %c0_2] : memref<32x128xbf16, #tpu.memory_space<vmem>>, vector<32x128xbf16>
    %cst = arith.constant dense<0.000000e+00> : vector<16x128xf32>
    %3 = tpu.matmul %1, %2, %cst {dimension_numbers = #tpu.dot_dimension_numbers<[1], [0], [0], [1], [0, 0, 1, 1], [], []>} : vector<16x32xbf16>, vector<32x128xbf16>, vector<16x128xf32> -> vector<16x128xf32>
    %c0_3 = arith.constant 0 : index
    %c0_4 = arith.constant 0 : index
    %4 = vector.load %arg3[%c0_3, %c0_4] : memref<1x128xf32, #tpu.memory_space<vmem>>, vector<1x128xf32>
    %5 = vector.broadcast %4 : vector<1x128xf32> to vector<16x128xf32>
    %6 = arith.addf %3, %5 : vector<16x128xf32>
    %7 = math.tanh %6 : vector<16x128xf32>
    %8 = arith.truncf %7 : vector<16x128xf32> to vector<16x128xbf16>
    %c0_5 = arith.constant 0 : index
    %c0_6 = arith.constant 0 : index
    %9 = vector.load %arg4[%c0_5, %c0_6] : memref<128x128xbf16, #tpu.memory_space<vmem>>, vector<128x128xbf16>
    %cst_7 = arith.constant dense<0.000000e+00> : vector<16x128xf32>
    %10 = tpu.matmul %8, %9, %cst_7 {dimension_numbers = #tpu.dot_dimension_numbers<[1], [0], [0], [1], [0, 0, 1, 1], [], []>} : vector<16x128xbf16>, vector<128x128xbf16>, vector<16x128xf32> -> vector<16x128xf32>
    %c0_8 = arith.constant 0 : index
    %c0_9 = arith.constant 0 : index
    %11 = vector.load %arg5[%c0_8, %c0_9] : memref<1x128xf32, #tpu.memory_space<vmem>>, vector<1x128xf32>
    %12 = vector.broadcast %11 : vector<1x128xf32> to vector<16x128xf32>
    %13 = arith.addf %10, %12 : vector<16x128xf32>
    %c0_10 = arith.constant 0 : index
    %c0_11 = arith.constant 0 : index
    %14 = vector.load %arg6[%c0_10, %c0_11] : memref<16x128xf32, #tpu.memory_space<vmem>>, vector<16x128xf32>
    tpu.vector_store %arg6[%c0_10, %c0_11], %13 {strides = array<i32>} : memref<16x128xf32, #tpu.memory_space<vmem>>, vector<16x128xf32>,
    return
  }
  func.func @transform_0(%arg0: i32) -> (i32, i32) {
    %c0_i32 = arith.constant 0 : i32
    %c0_i32_0 = arith.constant 0 : i32
    return %arg0, %c0_i32 : i32, i32
  }
  func.func @transform_1(%arg0: i32) -> (i32, i32) {
    %c0_i32 = arith.constant 0 : i32
    %c0_i32_0 = arith.constant 0 : i32
    %c0_i32_1 = arith.constant 0 : i32
    return %c0_i32, %c0_i32_0 : i32, i32
  }
  func.func @transform_2(%arg0: i32) -> (i32, i32) {
    %c0_i32 = arith.constant 0 : i32
    %c0_i32_0 = arith.constant 0 : i32
    %c0_i32_1 = arith.constant 0 : i32
    return %c0_i32, %c0_i32_0 : i32, i32
  }
  func.func @transform_3(%arg0: i32) -> (i32, i32) {
    %c0_i32 = arith.constant 0 : i32
    %c0_i32_0 = arith.constant 0 : i32
    %c0_i32_1 = arith.constant 0 : i32
    return %c0_i32, %c0_i32_0 : i32, i32
  }
  func.func @transform_4(%arg0: i32) -> (i32, i32) {
    %c0_i32 = arith.constant 0 : i32
    %c0_i32_0 = arith.constant 0 : i32
    %c0_i32_1 = arith.constant 0 : i32
    return %c0_i32, %c0_i32_0 : i32, i32
  }
  func.func @transform_5(%arg0: i32) -> (i32, i32) {
    %c0_i32 = arith.constant 0 : i32
    %c0_i32_0 = arith.constant 0 : i32
    return %arg0, %c0_i32 : i32, i32
  }
}

module attributes {stable_mosaic.version = 11 : i64} {
  func.func @_proj2_kernel(%arg0: i32, %arg1: memref<16x16xf32, #tpu.memory_space<vmem>>, %arg2: memref<16x128xbf16, #tpu.memory_space<vmem>>, %arg3: memref<1x128xf32, #tpu.memory_space<vmem>>, %arg4: memref<128x128xbf16, #tpu.memory_space<vmem>>, %arg5: memref<1x128xf32, #tpu.memory_space<vmem>>, %arg6: memref<16x128xf32, #tpu.memory_space<vmem>>) attributes {dimension_semantics = [#tpu.dimension_semantics<parallel>], iteration_bounds = array<i64: 1>, scalar_prefetch = 0 : i64, scratch_operands = 0 : i64, tpu.core_type = #tpu.core_type<tc>, window_params = [{transform_indices = @transform_0, window_bounds = array<i64: 16, 16>}, {pipeline_mode = #tpu.pipeline_mode<synchronous>, transform_indices = @transform_1, window_bounds = array<i64: 16, 128>}, {pipeline_mode = #tpu.pipeline_mode<synchronous>, transform_indices = @transform_2, window_bounds = array<i64: 1, 128>}, {pipeline_mode = #tpu.pipeline_mode<synchronous>, transform_indices = @transform_3, window_bounds = array<i64: 128, 128>}, {pipeline_mode = #tpu.pipeline_mode<synchronous>, transform_indices = @transform_4, window_bounds = array<i64: 1, 128>}, {transform_indices = @transform_5, window_bounds = array<i64: 16, 128>}]} {
    %c0 = arith.constant 0 : index
    %c0_0 = arith.constant 0 : index
    %0 = vector.load %arg1[%c0, %c0_0] : memref<16x16xf32, #tpu.memory_space<vmem>>, vector<16x16xf32>
    %1 = arith.truncf %0 : vector<16x16xf32> to vector<16x16xbf16>
    %c0_1 = arith.constant 0 : index
    %c0_2 = arith.constant 0 : index
    %2 = vector.load %arg2[%c0_1, %c0_2] : memref<16x128xbf16, #tpu.memory_space<vmem>>, vector<16x128xbf16>
    %cst = arith.constant dense<0.000000e+00> : vector<16x128xf32>
    %3 = tpu.matmul %1, %2, %cst {dimension_numbers = #tpu.dot_dimension_numbers<[1], [0], [0], [1], [0, 0, 1, 1], [], []>} : vector<16x16xbf16>, vector<16x128xbf16>, vector<16x128xf32> -> vector<16x128xf32>
    %c0_3 = arith.constant 0 : index
    %c0_4 = arith.constant 0 : index
    %4 = vector.load %arg3[%c0_3, %c0_4] : memref<1x128xf32, #tpu.memory_space<vmem>>, vector<1x128xf32>
    %5 = vector.broadcast %4 : vector<1x128xf32> to vector<16x128xf32>
    %6 = arith.addf %3, %5 : vector<16x128xf32>
    %7 = math.tanh %6 : vector<16x128xf32>
    %8 = arith.truncf %7 : vector<16x128xf32> to vector<16x128xbf16>
    %c0_5 = arith.constant 0 : index
    %c0_6 = arith.constant 0 : index
    %9 = vector.load %arg4[%c0_5, %c0_6] : memref<128x128xbf16, #tpu.memory_space<vmem>>, vector<128x128xbf16>
    %cst_7 = arith.constant dense<0.000000e+00> : vector<16x128xf32>
    %10 = tpu.matmul %8, %9, %cst_7 {dimension_numbers = #tpu.dot_dimension_numbers<[1], [0], [0], [1], [0, 0, 1, 1], [], []>} : vector<16x128xbf16>, vector<128x128xbf16>, vector<16x128xf32> -> vector<16x128xf32>
    %c0_8 = arith.constant 0 : index
    %c0_9 = arith.constant 0 : index
    %11 = vector.load %arg5[%c0_8, %c0_9] : memref<1x128xf32, #tpu.memory_space<vmem>>, vector<1x128xf32>
    %12 = vector.broadcast %11 : vector<1x128xf32> to vector<16x128xf32>
    %13 = arith.addf %10, %12 : vector<16x128xf32>
    %c0_10 = arith.constant 0 : index
    %c0_11 = arith.constant 0 : index
    %14 = vector.load %arg6[%c0_10, %c0_11] : memref<16x128xf32, #tpu.memory_space<vmem>>, vector<16x128xf32>
    tpu.vector_store %arg6[%c0_10, %c0_11], %13 {strides = array<i32>} : memref<16x128xf32, #tpu.memory_space<vmem>>, vector<16x128xf32>,
    return
  }
  func.func @transform_0(%arg0: i32) -> (i32, i32) {
    %c0_i32 = arith.constant 0 : i32
    %c0_i32_0 = arith.constant 0 : i32
    return %arg0, %c0_i32 : i32, i32
  }
  func.func @transform_1(%arg0: i32) -> (i32, i32) {
    %c0_i32 = arith.constant 0 : i32
    %c0_i32_0 = arith.constant 0 : i32
    %c0_i32_1 = arith.constant 0 : i32
    return %c0_i32, %c0_i32_0 : i32, i32
  }
  func.func @transform_2(%arg0: i32) -> (i32, i32) {
    %c0_i32 = arith.constant 0 : i32
    %c0_i32_0 = arith.constant 0 : i32
    %c0_i32_1 = arith.constant 0 : i32
    return %c0_i32, %c0_i32_0 : i32, i32
  }
  func.func @transform_3(%arg0: i32) -> (i32, i32) {
    %c0_i32 = arith.constant 0 : i32
    %c0_i32_0 = arith.constant 0 : i32
    %c0_i32_1 = arith.constant 0 : i32
    return %c0_i32, %c0_i32_0 : i32, i32
  }
  func.func @transform_4(%arg0: i32) -> (i32, i32) {
    %c0_i32 = arith.constant 0 : i32
    %c0_i32_0 = arith.constant 0 : i32
    %c0_i32_1 = arith.constant 0 : i32
    return %c0_i32, %c0_i32_0 : i32, i32
  }
  func.func @transform_5(%arg0: i32) -> (i32, i32) {
    %c0_i32 = arith.constant 0 : i32
    %c0_i32_0 = arith.constant 0 : i32
    return %arg0, %c0_i32 : i32, i32
  }
}

module attributes {stable_mosaic.version = 11 : i64} {
  func.func @_joint_kernel(%arg0: i32, %arg1: i32, %arg2: memref<1x8x128xf32, #tpu.memory_space<vmem>>, %arg3: memref<1x8x128xf32, #tpu.memory_space<vmem>>, %arg4: memref<128x128xbf16, #tpu.memory_space<vmem>>, %arg5: memref<1x128xf32, #tpu.memory_space<vmem>>, %arg6: memref<1x8x8x128xf32, #tpu.memory_space<vmem>>) attributes {dimension_semantics = [#tpu.dimension_semantics<parallel>, #tpu.dimension_semantics<parallel>], iteration_bounds = array<i64: 2, 1>, scalar_prefetch = 0 : i64, scratch_operands = 0 : i64, tpu.core_type = #tpu.core_type<tc>, window_params = [{transform_indices = @transform_0, window_bounds = array<i64: 1, 8, 128>}, {transform_indices = @transform_1, window_bounds = array<i64: 1, 8, 128>}, {pipeline_mode = #tpu.pipeline_mode<synchronous>, transform_indices = @transform_2, window_bounds = array<i64: 128, 128>}, {pipeline_mode = #tpu.pipeline_mode<synchronous>, transform_indices = @transform_3, window_bounds = array<i64: 1, 128>}, {transform_indices = @transform_4, window_bounds = array<i64: 1, 8, 8, 128>}]} {
    %c0 = arith.constant 0 : index
    %c0_0 = arith.constant 0 : index
    %c0_1 = arith.constant 0 : index
    %0 = vector.load %arg2[%c0, %c0_0, %c0_1] : memref<1x8x128xf32, #tpu.memory_space<vmem>>, vector<1x8x128xf32>
    %1 = vector.shape_cast %0 : vector<1x8x128xf32> to vector<8x128xf32>
    %c0_2 = arith.constant 0 : index
    %c0_3 = arith.constant 0 : index
    %c0_4 = arith.constant 0 : index
    %2 = vector.load %arg3[%c0_2, %c0_3, %c0_4] : memref<1x8x128xf32, #tpu.memory_space<vmem>>, vector<1x8x128xf32>
    %3 = vector.shape_cast %2 : vector<1x8x128xf32> to vector<8x128xf32>
    %4 = vector.shape_cast %1 : vector<8x128xf32> to vector<8x1x128xf32>
    %5 = vector.shape_cast %3 : vector<8x128xf32> to vector<1x8x128xf32>
    %6 = vector.broadcast %4 : vector<8x1x128xf32> to vector<8x8x128xf32>
    %7 = vector.broadcast %5 : vector<1x8x128xf32> to vector<8x8x128xf32>
    %8 = arith.addf %6, %7 : vector<8x8x128xf32>
    %9 = math.tanh %8 : vector<8x8x128xf32>
    %10 = vector.shape_cast %9 : vector<8x8x128xf32> to vector<64x128xf32>
    %11 = arith.truncf %10 : vector<64x128xf32> to vector<64x128xbf16>
    %c0_5 = arith.constant 0 : index
    %c0_6 = arith.constant 0 : index
    %12 = vector.load %arg4[%c0_5, %c0_6] : memref<128x128xbf16, #tpu.memory_space<vmem>>, vector<128x128xbf16>
    %cst = arith.constant dense<0.000000e+00> : vector<64x128xf32>
    %13 = tpu.matmul %11, %12, %cst {dimension_numbers = #tpu.dot_dimension_numbers<[1], [0], [0], [1], [0, 0, 1, 1], [], []>} : vector<64x128xbf16>, vector<128x128xbf16>, vector<64x128xf32> -> vector<64x128xf32>
    %c0_7 = arith.constant 0 : index
    %c0_8 = arith.constant 0 : index
    %14 = vector.load %arg5[%c0_7, %c0_8] : memref<1x128xf32, #tpu.memory_space<vmem>>, vector<1x128xf32>
    %15 = vector.broadcast %14 : vector<1x128xf32> to vector<64x128xf32>
    %16 = arith.addf %13, %15 : vector<64x128xf32>
    %cst_9 = arith.constant dense<0xFF800000> : vector<64xf32>
    %17 = vector.multi_reduction <maximumf>, %16, %cst_9 [1] : vector<64x128xf32> to vector<64xf32>
    %18 = vector.shape_cast %17 : vector<64xf32> to vector<64x1xf32>
    %19 = vector.broadcast %18 : vector<64x1xf32> to vector<64x128xf32>
    %20 = arith.subf %16, %19 : vector<64x128xf32>
    %21 = math.exp %20 : vector<64x128xf32>
    %cst_10 = arith.constant dense<0.000000e+00> : vector<64xf32>
    %22 = vector.multi_reduction <add>, %21, %cst_10 [1] : vector<64x128xf32> to vector<64xf32>
    %23 = vector.shape_cast %22 : vector<64xf32> to vector<64x1xf32>
    %24 = math.log %23 : vector<64x1xf32>
    %25 = vector.broadcast %24 : vector<64x1xf32> to vector<64x128xf32>
    %26 = arith.subf %20, %25 : vector<64x128xf32>
    %27 = vector.shape_cast %26 : vector<64x128xf32> to vector<1x8x8x128xf32>
    %c0_11 = arith.constant 0 : index
    %c0_12 = arith.constant 0 : index
    %c0_13 = arith.constant 0 : index
    %c0_14 = arith.constant 0 : index
    %28 = vector.load %arg6[%c0_11, %c0_12, %c0_13, %c0_14] : memref<1x8x8x128xf32, #tpu.memory_space<vmem>>, vector<1x8x8x128xf32>
    tpu.vector_store %arg6[%c0_11, %c0_12, %c0_13, %c0_14], %27 {strides = array<i32>} : memref<1x8x8x128xf32, #tpu.memory_space<vmem>>, vector<1x8x8x128xf32>,
    return
  }
  func.func @transform_0(%arg0: i32, %arg1: i32) -> (i32, i32, i32) {
    %c0_i32 = arith.constant 0 : i32
    %c0_i32_0 = arith.constant 0 : i32
    return %arg0, %arg1, %c0_i32 : i32, i32, i32
  }
  func.func @transform_1(%arg0: i32, %arg1: i32) -> (i32, i32, i32) {
    %c0_i32 = arith.constant 0 : i32
    %c0_i32_0 = arith.constant 0 : i32
    %c0_i32_1 = arith.constant 0 : i32
    return %arg0, %c0_i32, %c0_i32_0 : i32, i32, i32
  }
  func.func @transform_2(%arg0: i32, %arg1: i32) -> (i32, i32) {
    %c0_i32 = arith.constant 0 : i32
    %c0_i32_0 = arith.constant 0 : i32
    %c0_i32_1 = arith.constant 0 : i32
    return %c0_i32, %c0_i32_0 : i32, i32
  }
  func.func @transform_3(%arg0: i32, %arg1: i32) -> (i32, i32) {
    %c0_i32 = arith.constant 0 : i32
    %c0_i32_0 = arith.constant 0 : i32
    %c0_i32_1 = arith.constant 0 : i32
    return %c0_i32, %c0_i32_0 : i32, i32
  }
  func.func @transform_4(%arg0: i32, %arg1: i32) -> (i32, i32, i32, i32) {
    %c0_i32 = arith.constant 0 : i32
    %c0_i32_0 = arith.constant 0 : i32
    %c0_i32_1 = arith.constant 0 : i32
    return %arg0, %arg1, %c0_i32, %c0_i32_0 : i32, i32, i32, i32
  }
}

</mosaic_0001>

<bundles_post_ra>
// kernel: custom-call.9
= control target key start
LH: loop header
LB: loop body
LE: loop exit
PB: predicated region body
PF: predicated region fallthrough
CT: control target
= control target key end

     0   :  { %s6_s0 = inlined_call_operand.vmem [shape: f32[7,2,5], index: 0, kind: output, shape index: {}]  }

// kernel: transducer_forward.4
= control target key start
LH: loop header
LB: loop body
LE: loop exit
PB: predicated region body
PF: predicated region fallthrough
CT: control target
= control target key end

     0   :  { %v282_v0 = vmov 0.0   ;;  %vm283_vm0 = vmmov 0   ;;  %vm47_vm1 = vcmask 261120   ;;  %s362_s1 = inlined_call_operand.vmem [shape: bf16[32,128], index: 1, kind: input, shape index: {}]   ;;  %s363_s0 = inlined_call_operand.vmem [shape: f32[16,32], index: 0, kind: input, shape index: {}]   ;;  %s364_s3 = inlined_call_operand.vmem [shape: bf16[128,128], index: 3, kind: input, shape index: {}]   ;;  %s365_s2 = inlined_call_operand.vmem [shape: f32[1,128], index: 2, kind: input, shape index: {}]   ;;  %s366_s4 = inlined_call_operand.vmem [shape: f32[1,128], index: 4, kind: input, shape index: {}]   ;;  %s367_s5 = inlined_call_operand.vmem [shape: f32[16,128], index: 5, kind: output, shape index: {}]  }
   0x1   :  { %238 = vmatprep.subr.bf16.mxu0 %v282_v0  ;;  %v268_v1 = vld [vmem:[%s362_s1 + $0x8] sm:$0xff]   ;;  %242 = vmatprep.mubr.msk.bf16.mxu0 %vm283_vm0, %v282_v0  ;;  %v269_v2 = vld [vmem:[%s362_s1] sm:$0xff]   ;;  %v270_v5 = vld [vmem:[%s364_s3 + $0x38] sm:$0xff]  }
   0x2   :  { %246 = vmatprep.subr.bf16.mxu1 %v282_v0  ;;  %262 = vmatprep.mubr.msk.bf16.mxu1 %vm283_vm0, %v282_v0  ;;  %v21_v3 = vld [vmem:[%s363_s0] sm:$0xff]  ;;  %v22_v4 = vld [vmem:[%s363_s0 + $0x8] sm:$0xff]  ;;  %v271_v6 = vld [vmem:[%s364_s3 + $0x30] sm:$0xff]  }
   0x3   :  { %239 = vmatpush3.bf16.msra.mxu0 %v268_v1  ;;  %v23_v7 = vpack.c.bf16 %v22_v4, %v21_v3  ;;  %247 = vmatpush3.bf16.msra.mxu1 %v270_v5  ;;  %v272_v8 = vld [vmem:[%s364_s3 + $0x28] sm:$0xff]   ;;  %v273_v9 = vld [vmem:[%s364_s3 + $0x20] sm:$0xff]   ;;  %v274_v10 = vld [vmem:[%s364_s3 + $0x18] sm:$0xff]  }
   0x4   :  { %240 = vmatprep.subr.bf16.mxu0 %v282_v0  ;;  %248 = vmatprep.subr.bf16.mxu1 %v282_v0  ;;  %v275_v11 = vld [vmem:[%s364_s3 + $0x10] sm:$0xff]   ;;  %v276_v12 = vld [vmem:[%s364_s3 + $0x8] sm:$0xff]   ;;  %v277_v13 = vld [vmem:[%s364_s3] sm:$0xff]  }
   0x5   :  { %v213_v14 = vld [vmem:[%s365_s2] ss:$0 sm:$0xff] }
   0x6   :  { %v217_v24 = vld [vmem:[%s366_s4] ss:$0 sm:$0xff] }
   0x7   :  { %241 = vmatpush3.bf16.msra.mxu0 %v269_v2  ;;  %249 = vmatpush3.bf16.msra.mxu1 %v271_v6 }
   0x8   :  { %250 = vmatprep.subr.bf16.mxu1 %v282_v0 }
   0xa   :  { %243 = vmatmul.mubr.msk.bf16.vlgmr.msra.gmra.mxu0 %vm47_vm1, %v23_v7 }
   0xb   :  { %251 = vmatpush3.bf16.msra.mxu1 %v272_v8 }
   0xc   :  { %252 = vmatprep.subr.bf16.mxu1 %v282_v0 }
   0xf   :  { %253 = vmatpush3.bf16.msra.mxu1 %v273_v9 }
  0x10   :  { %254 = vmatprep.subr.bf16.mxu1 %v282_v0 }
  0x13   :  { %255 = vmatpush3.bf16.msra.mxu1 %v274_v10 }
  0x14   :  { %256 = vmatprep.subr.bf16.mxu1 %v282_v0 }
  0x17   :  { %257 = vmatpush3.bf16.msra.mxu1 %v275_v11 }
  0x18   :  { %258 = vmatprep.subr.bf16.mxu1 %v282_v0 }
  0x1b   :  { %259 = vmatpush3.bf16.msra.mxu1 %v276_v12 }
  0x1c   :  { %260 = vmatprep.subr.bf16.mxu1 %v282_v0 }
  0x1f   :  { %261 = vmatpush3.bf16.msra.mxu1 %v277_v13 }
  0xca   :  { %v85_v15 = vpop.f32.mrf.mxu0 }
  0xcb   :  { %v86_v16 = vadd.f32 %v213_v14, %v85_v15 }
  0xcc   :  { %v244_v17 = vpop.f32.mrf.mxu0 }
  0xcd   :  { %278 = vtanh.f32 %v86_v16 }
  0xce   :  { %v88_v18 = vpop.f32.mrf.mxu0 }
  0xcf   :  { %v89_v19 = vadd.f32 %v213_v14, %v88_v18 }
  0xd0   :  { %v245_v20 = vpop.f32.mrf.mxu0 }
  0xd1   :  { %280 = vtanh.f32 %v89_v19 }
  0xda   :  { %v279_v21 = vpop.eup %278 }
  0xde   :  { %v281_v22 = vpop.eup %280 }
  0xdf   :  { %v94_v23 = vpack.c.bf16 %v281_v22, %v279_v21 }
  0xe1   :  { %263 = vmatmul.mubr.bf16.vlgmr.msra.gmra.mxu1 %v94_v23 }
 0x1a1   :  { %v200_v25 = vpop.f32.mrf.mxu1 }
 0x1a2   :  { %v201_v26 = vadd.f32 %v217_v24, %v200_v25 }
 0x1a3   :  { %v264_v27 = vpop.f32.mrf.mxu1 }
 0x1a4   :  { %207 = vst [vmem:[%s367_s5] sm:$0xff] %v201_v26 }
 0x1a5   :  { %v203_v28 = vpop.f32.mrf.mxu1 }
 0x1a6   :  { %v204_v29 = vadd.f32 %v217_v24, %v203_v28 }
 0x1a7   :  { %v265_v30 = vpop.f32.mrf.mxu1 }
 0x1a8   :  { %208 = vst [vmem:[%s367_s5 + $0x8] sm:$0xff] %v204_v29 }

// kernel: transducer_forward.3
= control target key start
LH: loop header
LB: loop body
LE: loop exit
PB: predicated region body
PF: predicated region fallthrough
CT: control target
= control target key end

     0   :  { %v269_v0 = vmov 0.0   ;;  %vm270_vm0 = vmmov 0   ;;  %vm39_vm1 = vcmask 130048   ;;  %s346_s1 = inlined_call_operand.vmem [shape: bf16[16,128], index: 1, kind: input, shape index: {}]   ;;  %s347_s0 = inlined_call_operand.vmem [shape: f32[16,16], index: 0, kind: input, shape index: {}]   ;;  %s348_s3 = inlined_call_operand.vmem [shape: bf16[128,128], index: 3, kind: input, shape index: {}]   ;;  %s349_s2 = inlined_call_operand.vmem [shape: f32[1,128], index: 2, kind: input, shape index: {}]   ;;  %s350_s4 = inlined_call_operand.vmem [shape: f32[1,128], index: 4, kind: input, shape index: {}]   ;;  %s351_s5 = inlined_call_operand.vmem [shape: f32[16,128], index: 5, kind: output, shape index: {}]  }
   0x1   :  { %228 = vmatprep.subr.bf16.mxu0 %v269_v0  ;;  %v256_v1 = vld [vmem:[%s346_s1] sm:$0xff]   ;;  %230 = vmatprep.mubr.msk.bf16.mxu0 %vm270_vm0, %v269_v0  ;;  %v22_v3 = vld [vmem:[%s347_s0 + $0x8] sm:$0xff]  ;;  %v257_v5 = vld [vmem:[%s348_s3 + $0x38] sm:$0xff]  }
   0x2   :  { %v21_v2 = vld [vmem:[%s347_s0] sm:$0xff]  ;;  %234 = vmatprep.subr.bf16.mxu1 %v269_v0  ;;  %250 = vmatprep.mubr.msk.bf16.mxu1 %vm270_vm0, %v269_v0  ;;  %v258_v6 = vld [vmem:[%s348_s3 + $0x30] sm:$0xff]   ;;  %v259_v7 = vld [vmem:[%s348_s3 + $0x28] sm:$0xff]  }
   0x3   :  { %229 = vmatpush3.bf16.msra.mxu0 %v256_v1  ;;  %v23_v4 = vpack.c.bf16 %v22_v3, %v21_v2  ;;  %235 = vmatpush3.bf16.msra.mxu1 %v257_v5  ;;  %v260_v8 = vld [vmem:[%s348_s3 + $0x20] sm:$0xff]   ;;  %v261_v9 = vld [vmem:[%s348_s3 + $0x18] sm:$0xff]   ;;  %v262_v10 = vld [vmem:[%s348_s3 + $0x10] sm:$0xff]  }
   0x4   :  { %236 = vmatprep.subr.bf16.mxu1 %v269_v0  ;;  %v263_v11 = vld [vmem:[%s348_s3 + $0x8] sm:$0xff]   ;;  %v264_v12 = vld [vmem:[%s348_s3] sm:$0xff]  }
   0x5   :  { %v205_v13 = vld [vmem:[%s349_s2] ss:$0 sm:$0xff] }
   0x6   :  { %231 = vmatmul.mubr.msk.bf16.vlgmr.msra.gmra.mxu0 %vm39_vm1, %v23_v4  ;;  %v208_v23 = vld [vmem:[%s350_s4] ss:$0 sm:$0xff] }
   0x7   :  { %237 = vmatpush3.bf16.msra.mxu1 %v258_v6 }
   0x8   :  { %238 = vmatprep.subr.bf16.mxu1 %v269_v0 }
   0xb   :  { %239 = vmatpush3.bf16.msra.mxu1 %v259_v7 }
   0xc   :  { %240 = vmatprep.subr.bf16.mxu1 %v269_v0 }
   0xf   :  { %241 = vmatpush3.bf16.msra.mxu1 %v260_v8 }
  0x10   :  { %242 = vmatprep.subr.bf16.mxu1 %v269_v0 }
  0x13   :  { %243 = vmatpush3.bf16.msra.mxu1 %v261_v9 }
  0x14   :  { %244 = vmatprep.subr.bf16.mxu1 %v269_v0 }
  0x17   :  { %245 = vmatpush3.bf16.msra.mxu1 %v262_v10 }
  0x18   :  { %246 = vmatprep.subr.bf16.mxu1 %v269_v0 }
  0x1b   :  { %247 = vmatpush3.bf16.msra.mxu1 %v263_v11 }
  0x1c   :  { %248 = vmatprep.subr.bf16.mxu1 %v269_v0 }
  0x1f   :  { %249 = vmatpush3.bf16.msra.mxu1 %v264_v12 }
  0xc6   :  { %v77_v14 = vpop.f32.mrf.mxu0 }
  0xc7   :  { %v78_v15 = vadd.f32 %v205_v13, %v77_v14 }
  0xc8   :  { %v232_v16 = vpop.f32.mrf.mxu0 }
  0xc9   :  { %265 = vtanh.f32 %v78_v15 }
  0xca   :  { %v80_v17 = vpop.f32.mrf.mxu0 }
  0xcb   :  { %v81_v18 = vadd.f32 %v205_v13, %v80_v17 }
  0xcc   :  { %v233_v19 = vpop.f32.mrf.mxu0 }
  0xcd   :  { %267 = vtanh.f32 %v81_v18 }
  0xd6   :  { %v266_v20 = vpop.eup %265 }
  0xda   :  { %v268_v21 = vpop.eup %267 }
  0xdb   :  { %v86_v22 = vpack.c.bf16 %v268_v21, %v266_v20 }
  0xdd   :  { %251 = vmatmul.mubr.bf16.vlgmr.msra.gmra.mxu1 %v86_v22 }
 0x19d   :  { %v192_v24 = vpop.f32.mrf.mxu1 }
 0x19e   :  { %v193_v25 = vadd.f32 %v208_v23, %v192_v24 }
 0x19f   :  { %v252_v26 = vpop.f32.mrf.mxu1 }
 0x1a0   :  { %199 = vst [vmem:[%s351_s5] sm:$0xff] %v193_v25 }
 0x1a1   :  { %v195_v27 = vpop.f32.mrf.mxu1 }
 0x1a2   :  { %v196_v28 = vadd.f32 %v208_v23, %v195_v27 }
 0x1a3   :  { %v253_v29 = vpop.f32.mrf.mxu1 }
 0x1a4   :  { %200 = vst [vmem:[%s351_s5 + $0x8] sm:$0xff] %v196_v28 }

// kernel: transducer_forward.5
= control target key start
LH: loop header
LB: loop body
LE: loop exit
PB: predicated region body
PF: predicated region fallthrough
CT: control target
= control target key end

     0   :  { %s884_s15 = smov 0   ;;  %s886_s16 = smov 0   ;;  %s993_s0 = inlined_call_operand.vmem [shape: f32[2,8,128], index: 0, kind: input, shape index: {}]   ;;  %s994_s1 = inlined_call_operand.vmem [shape: f32[2,8,128], index: 1, kind: input, shape index: {}]   ;;  %s995_s2 = inlined_call_operand.vmem [shape: bf16[128,128], index: 2, kind: input, shape index: {}]   ;;  %s996_s3 = inlined_call_operand.vmem [shape: f32[1,128], index: 3, kind: input, shape index: {}]   ;;  %s997_s4 = inlined_call_operand.vmem [shape: f32[2,8,8,128], index: 4, kind: output, shape index: {}]  }
   0x1   :  { %s888_s17 = smov 0  }
   0x2 LB: > { %s26_s18 = sadd.s32 1, %s852_s16  ;;  %p683_p0 = scmp.ge.s32.totalorder %s856_s17, 1  ;;  %s856_s17 = sphi %s888_s17, %s14_s17   ;;  %s852_s16 = sphi %s886_s16, %s999_s16   ;;  %s848_s15 = sphi %s884_s15, %s998_s15  }
   0x3   : > { %p28_p1 = scmp.ge.s32.totalorder %s26_s18, 2  ;;  %p189_p2 = scmp.lt.s32.totalorder %s856_s17, 3 }
   0x5   : > { %s1001_s18 = smov (%p28_p1, %s26_s18), 0  ;;  %p190_p3 = pnand %p683_p0, %p189_p2 }
   0x6   : > { %p225_p4 = scmp.lt.s32.totalorder (!%p190_p3), %s848_s15, 1 }
   0x7   : > { %193 = sbr.rel (%p190_p3) target bundleno = 573 (0x23d), region = 36 }
   0xc   : > { %v777_v0 = vld [vmem:[%s995_s2 + $0x38] sm:$0xff]   ;;  %v778_v1 = vld [vmem:[%s995_s2 + $0x30] sm:$0xff]   ;;  %s1003_s15 = smov (!%p225_p4, %s848_s15), 1  ;;  %v779_v2 = vld [vmem:[%s995_s2 + $0x28] sm:$0xff]   ;;  %v254_v3 = vlaneseq  ;;  %v858_v6 = vmov 1966171168  }
   0xd   : > { %712 = vmatprep.subr.bf16.mxu0 %v777_v0  ;;  %736 = vmatprep.subr.bf16.mxu1 %v777_v0  ;;  %s684_s25 = sshll.u32 %s1003_s15, 3  ;;  %v780_v4 = vld [vmem:[%s995_s2 + $0x20] sm:$0xff]   ;;  %v252_v7 = vunpack.c.l.s4 %v858_v6  ;;  %v781_v11 = vld [vmem:[%s995_s2 + $0x18] sm:$0xff]   ;;  %v782_v16 = vld [vmem:[%s995_s2 + $0x10] sm:$0xff]   ;;  %s699_s22 = sshll.u32 %s1003_s15, 6 }
   0xe   : > { %713 = vmatpush3.bf16.msra.mxu0 %v777_v0  ;;  %744 = vmatpush3.bf16.msra.mxu1 %v777_v0  ;;  %s231_s28 = scalar_lea.vmem %s993_s0, %s684_s25  ;;  %v255_v8 = vshrl.u32 %v254_v3, 7  ;;  %s235_s9 = scalar_lea.vmem %s994_s1, %s684_s25  ;;  %v783_v25 = vld [vmem:[%s995_s2 + $0x8] sm:$0xff]   ;;  %v784_v40 = vld [vmem:[%s995_s2] sm:$0xff]  }
   0xf   : > { %714 = vmatprep.subr.bf16.mxu0 %v778_v1  ;;  %737 = vmatprep.subr.bf16.mxu1 %v778_v1  ;;  %v247_v5 = vld [vmem:[%s231_s28] sm:$0xff]  ;;  %v253_v9 = vunpack.c.0.s8 %v252_v7  ;;  %s966_s25 = scalar_lea.vmem %s997_s4, %s699_s22 }
  0x10   : > { %v250_v10 = vcombine.high %v247_v5, %v247_v5  ;;  %v301_v14 = vsub.s32 0, %v255_v8  ;;  %v248_v21 = vld [vmem:[%s235_s9] sm:$0xff] }
  0x11   : > { %v256_v12 = vsub.s32 %v253_v9, %v255_v8  ;;  %v688_v58 = vld [vmem:[%s996_s3] ss:$0 sm:$0xff] }
  0x12   : > { %715 = vmatpush3.bf16.msra.mxu0 %v778_v1  ;;  %745 = vmatpush3.bf16.msra.mxu1 %v778_v1 }
  0x13   : > { %716 = vmatprep.subr.bf16.mxu0 %v779_v2  ;;  %738 = vmatprep.subr.bf16.mxu1 %v779_v2  ;;  %v257_v13 = vrot.slane %v247_v5, %v256_v12  ;;  %v264_v15 = vrot.slane %v250_v10, %v256_v12 }
  0x15   : > { %v265_v17 = vcombine.high %v257_v13, %v257_v13  ;;  %v273_v18 = vrot.slane %v257_v13, %v256_v12  ;;  %v266_v19 = vcombine.high %v264_v15, %v264_v15  ;;  %v280_v20 = vrot.slane %v264_v15, %v256_v12 }
  0x16   : > { %717 = vmatpush3.bf16.msra.mxu0 %v779_v2  ;;  %746 = vmatpush3.bf16.msra.mxu1 %v779_v2 }
  0x17   : > { %718 = vmatprep.subr.bf16.mxu0 %v780_v4  ;;  %739 = vmatprep.subr.bf16.mxu1 %v780_v4  ;;  %v287_v22 = vrot.slane %v265_v17, %v256_v12  ;;  %v295_v23 = vcombine.high %v273_v18, %v273_v18  ;;  %v302_v24 = vrot.slane %v273_v18, %v301_v14 }
  0x18   : > { %v294_v26 = vrot.slane %v266_v19, %v256_v12  ;;  %v296_v27 = vcombine.high %v280_v20, %v280_v20  ;;  %v318_v28 = vrot.slane %v280_v20, %v301_v14 }
  0x19   : > { %v297_v29 = vcombine.high %v287_v22, %v287_v22  ;;  %v306_v30 = vrot.slane %v287_v22, %v301_v14  ;;  %v339_v31 = vadd.f32 %v302_v24, %v248_v21  ;;  %v310_v32 = vrot.slane %v295_v23, %v301_v14 }
  0x1a   : > { %719 = vmatpush3.bf16.msra.mxu0 %v780_v4  ;;  %747 = vmatpush3.bf16.msra.mxu1 %v780_v4  ;;  %v298_v33 = vcombine.high %v294_v26, %v294_v26  ;;  %v322_v34 = vrot.slane %v294_v26, %v301_v14  ;;  %v343_v35 = vadd.f32 %v318_v28, %v248_v21 }
  0x1b   : > { %720 = vmatprep.subr.bf16.mxu0 %v781_v11  ;;  %740 = vmatprep.subr.bf16.mxu1 %v781_v11  ;;  %v326_v36 = vrot.slane %v296_v27, %v301_v14  ;;  %v340_v37 = vadd.f32 %v306_v30, %v248_v21  ;;  %786 = vtanh.f32 %v339_v31  ;;  %v314_v38 = vrot.slane %v297_v29, %v301_v14 }
  0x1c   : > { %v341_v39 = vadd.f32 %v310_v32, %v248_v21  ;;  %v344_v41 = vadd.f32 %v322_v34, %v248_v21  ;;  %788 = vtanh.f32 %v343_v35  ;;  %v330_v42 = vrot.slane %v298_v33, %v301_v14 }
  0x1d   : > { %790 = vtanh.f32 %v340_v37  ;;  %v342_v43 = vadd.f32 %v314_v38, %v248_v21  ;;  %v345_v44 = vadd.f32 %v326_v36, %v248_v21 }
  0x1e   : > { %721 = vmatpush3.bf16.msra.mxu0 %v781_v11  ;;  %748 = vmatpush3.bf16.msra.mxu1 %v781_v11  ;;  %792 = vtanh.f32 %v341_v39  ;;  %v346_v45 = vadd.f32 %v330_v42, %v248_v21 }
  0x1f   : > { %722 = vmatprep.subr.bf16.mxu0 %v782_v16  ;;  %741 = vmatprep.subr.bf16.mxu1 %v782_v16  ;;  %794 = vtanh.f32 %v342_v43 }
  0x20   : > { %796 = vtanh.f32 %v344_v41 }
  0x21   : > { %798 = vtanh.f32 %v345_v44 }
  0x22   : > { %723 = vmatpush3.bf16.msra.mxu0 %v782_v16  ;;  %749 = vmatpush3.bf16.msra.mxu1 %v782_v16  ;;  %800 = vtanh.f32 %v346_v45 }
  0x23   : > { %724 = vmatprep.subr.bf16.mxu0 %v783_v25  ;;  %742 = vmatprep.subr.bf16.mxu1 %v783_v25 }
  0x26   : > { %725 = vmatpush3.bf16.msra.mxu0 %v783_v25  ;;  %750 = vmatpush3.bf16.msra.mxu1 %v783_v25 }
  0x27   : > { %726 = vmatprep.subr.bf16.mxu0 %v784_v40  ;;  %743 = vmatprep.subr.bf16.mxu1 %v784_v40 }
  0x28   : > { %v787_v46 = vpop.eup %786 }
  0x29   : > { %v789_v47 = vpop.eup %788 }
  0x2a   : > { %727 = vmatpush3.bf16.msra.mxu0 %v784_v40  ;;  %751 = vmatpush3.bf16.msra.mxu1 %v784_v40  ;;  %v791_v48 = vpop.eup %790 }
  0x2b   : > { %v793_v49 = vpop.eup %792  ;;  %v355_v50 = vpack.c.bf16 %v791_v48, %v787_v46 }
  0x2c   : > { %v795_v51 = vpop.eup %794 }
  0x2d   : > { %v797_v52 = vpop.eup %796  ;;  %728 = vmatprep.mubr.bf16.mxu0 %v355_v50  ;;  %v356_v53 = vpack.c.bf16 %v795_v51, %v793_v49 }
  0x2e   : > { %v799_v54 = vpop.eup %798  ;;  %v357_v55 = vpack.c.bf16 %v797_v52, %v789_v47 }
  0x2f   : > { %v801_v56 = vpop.eup %800  ;;  %729 = vmatmul.mubr.bf16.vlgmr.msra.gmra.mxu0 %v356_v53 }
  0x30   : > { %732 = vmatprep.mubr.bf16.mxu1 %v357_v55  ;;  %v358_v57 = vpack.c.bf16 %v801_v56, %v799_v54 }
  0x32   : > { %733 = vmatmul.mubr.bf16.vlgmr.msra.gmra.mxu1 %v358_v57 }
  0xef   : > { %v730_v59 = vpop.f32.mrf.mxu0 }
  0xf0   : > { %v473_v60 = vadd.f32 %v730_v59, %v688_v58 }
  0xf1   : > { %v464_v61 = vpop.f32.mrf.mxu0 }
  0xf2   : > { %v465_v62 = vadd.f32 %v688_v58, %v464_v61  ;;  %v734_v63 = vpop.f32.mrf.mxu1  ;;  %499 = vmax.xlane.f32.xlu1 %v473_v60 }
  0xf3   : > { %v731_v0 = vpop.f32.mrf.mxu0  ;;  %v489_v10 = vadd.f32 %v734_v63, %v688_v58 }
  0xf4   : > { %v476_v1 = vadd.f32 %v731_v0, %v688_v58  ;;  %v480_v2 = vpop.f32.mrf.mxu1  ;;  %495 = vmax.xlane.f32.xlu0 %v465_v62 }
  0xf5   : > { %v481_v3 = vadd.f32 %v688_v58, %v480_v2  ;;  %v467_v5 = vpop.f32.mrf.mxu0 }
  0xf6   : > { %v735_v4 = vpop.f32.mrf.mxu1  ;;  %501 = vmax.xlane.f32.xlu1 %v476_v1  ;;  %v468_v8 = vadd.f32 %v688_v58, %v467_v5 }
  0xf7   : > { %v492_v9 = vadd.f32 %v735_v4, %v688_v58 }
  0xf8   : > { %v483_v6 = vpop.f32.mrf.mxu1  ;;  %503 = vmax.xlane.f32.xlu0 %v481_v3 }
  0xf9   : > { %v484_v7 = vadd.f32 %v688_v58, %v483_v6 }
  0xfb   : > { %505 = vmax.xlane.f32.xlu1 %v484_v7 }
  0xfc   : > { %497 = vmax.xlane.f32.xlu0 %v468_v8 }
  0xff   : > { %509 = vmax.xlane.f32.xlu1 %v492_v9 }
 0x100   : > { %507 = vmax.xlane.f32.xlu0 %v489_v10 }
 0x17b   : > { %v500_v11 = vpop.xlane.xlu1 %499 }
 0x17c   : > { %v938_v12 = vsub.f32 %v473_v60, %v500_v11 }
 0x17d   : > { %v496_v13 = vpop.xlane.xlu0 %495 }
 0x17e   : > { %v523_v14 = vmul.f32 1.442695, %v938_v12  ;;  %v941_v15 = vsub.f32 %v465_v62, %v496_v13 }
 0x17f   : > { %v502_v16 = vpop.xlane.xlu1 %501 }
 0x180   : > { %802 = vpow2.f32 %v523_v14  ;;  %v519_v17 = vmul.f32 1.442695, %v941_v15  ;;  %v944_v18 = vsub.f32 %v476_v1, %v502_v16 }
 0x181   : > { %v504_v19 = vpop.xlane.xlu0 %503 }
 0x182   : > { %v525_v20 = vmul.f32 1.442695, %v944_v18  ;;  %v947_v21 = vsub.f32 %v481_v3, %v504_v19  ;;  %804 = vpow2.f32 %v519_v17 }
 0x184   : > { %806 = vpow2.f32 %v525_v20  ;;  %v527_v22 = vmul.f32 1.442695, %v947_v21  ;;  %v506_v23 = vpop.xlane.xlu1 %505 }
 0x185   : > { %v950_v24 = vsub.f32 %v484_v7, %v506_v23  ;;  %v498_v25 = vpop.xlane.xlu0 %497 }
 0x186   : > { %v952_v26 = vsub.f32 %v468_v8, %v498_v25  ;;  %808 = vpow2.f32 %v527_v22 }
 0x187   : > { %v529_v29 = vmul.f32 1.442695, %v950_v24 }
 0x188   : > { %v521_v27 = vmul.f32 1.442695, %v952_v26  ;;  %v510_v28 = vpop.xlane.xlu1 %509 }
 0x189   : > { %v508_v30 = vpop.xlane.xlu0 %507  ;;  %v956_v31 = vsub.f32 %v492_v9, %v510_v28 }
 0x18a   : > { %810 = vpow2.f32 %v521_v27  ;;  %v958_v32 = vsub.f32 %v489_v10, %v508_v30 }
 0x18b   : > { %812 = vpow2.f32 %v529_v29  ;;  %v533_v35 = vmul.f32 1.442695, %v956_v31 }
 0x18c   : > { %v531_v33 = vmul.f32 1.442695, %v958_v32 }
 0x18d   : > { %v803_v34 = vpop.eup %802 }
 0x18e   : > { %814 = vpow2.f32 %v531_v33  ;;  %539 = vadd.xlane.f32.xlu0 %v803_v34 }
 0x18f   : > { %v805_v36 = vpop.eup %804  ;;  %816 = vpow2.f32 %v533_v35 }
 0x191   : > { %v807_v37 = vpop.eup %806 }
 0x192   : > { %541 = vadd.xlane.f32.xlu1 %v807_v37  ;;  %535 = vadd.xlane.f32.xlu0 %v805_v36 }
 0x193   : > { %v809_v38 = vpop.eup %808 }
 0x196   : > { %543 = vadd.xlane.f32.xlu0 %v809_v38 }
 0x197   : > { %v811_v39 = vpop.eup %810 }
 0x198   : > { %537 = vadd.xlane.f32.xlu1 %v811_v39  ;;  %v813_v40 = vpop.eup %812 }
 0x19b   : > { %v815_v41 = vpop.eup %814 }
 0x19c   : > { %545 = vadd.xlane.f32.xlu1 %v813_v40  ;;  %547 = vadd.xlane.f32.xlu0 %v815_v41  ;;  %v817_v42 = vpop.eup %816 }
 0x1a0   : > { %549 = vadd.xlane.f32.xlu1 %v817_v42 }
 0x217   : > { %v540_v43 = vpop.xlane.xlu0 %539 }
 0x218   : > { %818 = vlog2.f32 %v540_v43 }
 0x21b   : > { %v542_v44 = vpop.xlane.xlu1 %541  ;;  %v536_v45 = vpop.xlane.xlu0 %535 }
 0x21c   : > { %820 = vlog2.f32 %v542_v44 }
 0x21d   : > { %822 = vlog2.f32 %v536_v45 }
 0x21f   : > { %v544_v46 = vpop.xlane.xlu0 %543 }
 0x220   : > { %824 = vlog2.f32 %v544_v46 }
 0x221   : > { %v538_v47 = vpop.xlane.xlu1 %537 }
 0x222   : > { %826 = vlog2.f32 %v538_v47 }
 0x225   : > { %v819_v48 = vpop.eup %818  ;;  %v546_v49 = vpop.xlane.xlu1 %545 }
 0x226   : > { %v548_v50 = vpop.xlane.xlu0 %547  ;;  %v556_v51 = vmul.f32 0.6931472, %v819_v48  ;;  %828 = vlog2.f32 %v546_v49 }
 0x227   : > { %830 = vlog2.f32 %v548_v50 }
 0x228   : > { %v569_v52 = vsub.f32 %v938_v12, %v556_v51 }
 0x229   : > { %v821_v53 = vpop.eup %820  ;;  %v550_v54 = vpop.xlane.xlu1 %549 }
 0x22a   : > { %v823_v55 = vpop.eup %822  ;;  %577 = vst [vmem:[%s966_s25 + $0x10] sm:$0xff] %v569_v52  ;;  %v558_v56 = vmul.f32 0.6931472, %v821_v53  ;;  %832 = vlog2.f32 %v550_v54 }
 0x22b   : > { %v552_v57 = vmul.f32 0.6931472, %v823_v55 }
 0x22c   : > { %v570_v58 = vsub.f32 %v944_v18, %v558_v56 }
 0x22d   : > { %v825_v59 = vpop.eup %824  ;;  %v567_v60 = vsub.f32 %v941_v15, %v552_v57 }
 0x22e   : > { %578 = vst [vmem:[%s966_s25 + $0x18] sm:$0xff] %v570_v58  ;;  %v560_v61 = vmul.f32 0.6931472, %v825_v59 }
 0x22f   : > { %v827_v62 = vpop.eup %826  ;;  %575 = vst [vmem:[%s966_s25] sm:$0xff] %v567_v60 }
 0x230   : > { %v571_v63 = vsub.f32 %v947_v21, %v560_v61  ;;  %v554_v0 = vmul.f32 0.6931472, %v827_v62 }
 0x232   : > { %579 = vst [vmem:[%s966_s25 + $0x20] sm:$0xff] %v571_v63  ;;  %v568_v1 = vsub.f32 %v952_v26, %v554_v0 }
 0x233   : > { %v829_v2 = vpop.eup %828 }
 0x234   : > { %v831_v3 = vpop.eup %830  ;;  %576 = vst [vmem:[%s966_s25 + $0x8] sm:$0xff] %v568_v1  ;;  %v562_v4 = vmul.f32 0.6931472, %v829_v2 }
 0x235   : > { %v564_v5 = vmul.f32 0.6931472, %v831_v3 }
 0x236   : > { %v572_v6 = vsub.f32 %v950_v24, %v562_v4 }
 0x237   : > { %v833_v7 = vpop.eup %832  ;;  %v573_v8 = vsub.f32 %v958_v32, %v564_v5 }
 0x238   : > { %580 = vst [vmem:[%s966_s25 + $0x28] sm:$0xff] %v572_v6  ;;  %v566_v9 = vmul.f32 0.6931472, %v833_v7 }
 0x239   : > { %581 = vst [vmem:[%s966_s25 + $0x30] sm:$0xff] %v573_v8 }
 0x23a   : > { %v574_v10 = vsub.f32 %v956_v31, %v566_v9 }
 0x23c   : > { %582 = vst [vmem:[%s966_s25 + $0x38] sm:$0xff] %v574_v10 }
 0x23d PF: > { %s14_s17 = sadd.s32 1, %s856_s17   ;;  %s998_s15 = smov %s852_s16 }
 0x23e   : > { %p11_p5 = scmp.ge.s32.totalorder %s14_s17, 4   ;;  %s999_s16 = smov %s1001_s18 }
 0x240   :  { %13 = sbr.rel (!%p11_p5) target bundleno = 2 (0x2), region = 69 }

// kernel: custom-call.11
= control target key start
LH: loop header
LB: loop body
LE: loop exit
PB: predicated region body
PF: predicated region fallthrough
CT: control target
= control target key end

     0   :  { %s6_s0 = inlined_call_operand.vmem [shape: f32[4,2], index: 0, kind: output, shape index: {}]  }

</bundles_post_ra>
